<compile_context>
chip_gen: v5e
topology: v5e:2x2
jax: 0.10.0
libtpu: 0.0.40
codegen_flags: <defaults>
</compile_context>

<pallas_src>
from functools import partial

import jax
import jax.numpy as jnp
from jax.experimental import pallas as pl
from jax.experimental.pallas import tpu as pltpu


def add_broadcast_kernel(a_ref, b_ref, o_ref, *, reps):
    # a_ref/o_ref: (I, J*K) laid out as (i, j*K + k); b_ref: (I, K) = (i, k).
    # out[i, j*K+k] = a[i, j*K+k] + b[i, k]  ==  lane-tile b J times, then add.
    o_ref[...] = a_ref[...] + jnp.tile(b_ref[...], (1, reps))


def broadcast_add(a, b):
    # Flatten to single-tile 2-D layouts; grid-less whole-array VMEM blocks.
    i, j, k = a.shape           # (3, 3, 3)
    a2 = a.reshape(i, j * k)    # (3, 9)  — one padded (8,128) tile
    b2 = b.reshape(i, k)        # (3, 3)  — one padded (8,128) tile
    out2 = pl.pallas_call(
        partial(add_broadcast_kernel, reps=j),
        out_shape=jax.ShapeDtypeStruct((i, j * k), a.dtype),
        in_specs=[
            pl.BlockSpec(memory_space=pltpu.MemorySpace.VMEM),
            pl.BlockSpec(memory_space=pltpu.MemorySpace.VMEM),
        ],
        out_specs=pl.BlockSpec(memory_space=pltpu.MemorySpace.VMEM),
        input_output_aliases={0: 0},  # output reuses a2's buffer (same shape/dtype)
    )(a2, b2)
    return out2.reshape(i, j, k)


if __name__ == "__main__":
    key = jax.random.PRNGKey(0)
    ka, kb = jax.random.split(key)
    # Match the module's tensor shapes: a ~ (3, 3, 3), b ~ (3, 1, 3), uniform [0, 1)
    a = jax.random.uniform(ka, (3, 3, 3), dtype=jnp.float32)
    b = jax.random.uniform(kb, (3, 1, 3), dtype=jnp.float32)

    # Reference = plain JAX broadcasting semantics (identical to torch `a + b`).
    ref = jax.block_until_ready(a + b)

    out = broadcast_add(a, b)
    jax.block_until_ready(out)

    assert out.shape == (3, 3, 3)
    # Both paths perform the identical f32 add, so exact equality is expected.
    assert jnp.array_equal(out, ref), "mismatch vs reference"
    print("KERNEL_OK")
</pallas_src>

<mosaic_0001>
module attributes {stable_mosaic.version = 11 : i64} {
  func.func @add_broadcast_kernel(%arg0: memref<3x9xf32, #tpu.memory_space<vmem>>, %arg1: memref<3x3xf32, #tpu.memory_space<vmem>>, %arg2: memref<3x9xf32, #tpu.memory_space<vmem>>) attributes {dimension_semantics = [], scalar_prefetch = 0 : i64, scratch_operands = 0 : i64, tpu.core_type = #tpu.core_type<tc>} {
    %c0 = arith.constant 0 : index
    %c0_0 = arith.constant 0 : index
    %0 = vector.load %arg0[%c0, %c0_0] : memref<3x9xf32, #tpu.memory_space<vmem>>, vector<3x9xf32>
    %c0_1 = arith.constant 0 : index
    %c0_2 = arith.constant 0 : index
    %1 = vector.load %arg1[%c0_1, %c0_2] : memref<3x3xf32, #tpu.memory_space<vmem>>, vector<3x3xf32>
    %2 = tpu.concatenate %1, %1, %1 in 1 : vector<3x3xf32>, vector<3x3xf32>, vector<3x3xf32> -> vector<3x9xf32>
    %3 = arith.addf %0, %2 : vector<3x9xf32>
    %c0_3 = arith.constant 0 : index
    %c0_4 = arith.constant 0 : index
    %4 = vector.load %arg2[%c0_3, %c0_4] : memref<3x9xf32, #tpu.memory_space<vmem>>, vector<3x9xf32>
    tpu.vector_store %arg2[%c0_3, %c0_4], %3 {strides = array<i32>} : memref<3x9xf32, #tpu.memory_space<vmem>>, vector<3x9xf32>,
    return
  }
}

</mosaic_0001>

<bundles_post_ra>
// kernel: tpu_custom_call.1
= control target key start
LH: loop header
LB: loop body
LE: loop exit
PB: predicated region body
PF: predicated region fallthrough
CT: control target
= control target key end

     0   :  { %7 = vsyncpa [#allocation3], 0  ;;  %s143_s0 = inlined_call_operand.hbm [shape: f32[3,9], index: 0, kind: input, shape index: {}, may-alias: {0,2}]   ;;  %s144_s1 = inlined_call_operand.vmem [shape: f32[3,3], index: 1, kind: input, shape index: {}]   ;;  %s145_s2 = inlined_call_operand.hbm [shape: f32[3,9], index: 2, kind: output, shape index: {}, may-alias: {0,2}]  }
   0x1   :  { %8 = vsyncpa [#allocation4], 0  ;;  %s14_s11 = sshll.u32 %s143_s0, 4  ;;  %s115_s12 = smov [#allocation2]   ;;  %s15_s11 = int_to_ptr.hbm [resolvable:$true] %s14_s11 }
   0x2   :  { %s16_s13 = sshll.u32 %s115_s12, 4  ;;  %s17_s13 = int_to_ptr.vmem [resolvable:$true] %s16_s13 }
   0x3   :  { %19 = dma.hbm_to_vmem [thread:$0]  %s15_s11, 64, %s17_s13, [#allocation3]  }
   0x4   :  { %111 = dma.done.wait [#allocation3], 64  }
   0x5   :  { %112 = vsyncadd [#allocation3], 4294967232  ;;  %v27_v0 = vld [vmem:[%s144_s1] sm:$0x7]  ;;  %s116_s16 = smov 3   ;;  %s117_s17 = smov 6  }
   0x6   :  { %29 = vrot.lane.b32.xlu0 %v27_v0, %s116_s16  ;;  %vm35_vm0 = vcmask 23552   ;;  %vm37_vm1 = vcmask 48128   ;;  %v26_v2 = vld [vmem:[#allocation2] sm:$0x7]  ;;  %s118_s0 = smov [#allocation5]   ;;  %s49_s21 = sshll.u32 %s145_s2, 4  ;;  %s50_s21 = int_to_ptr.hbm [resolvable:$true] %s49_s21 }
   0x7   :  { %s47_s18 = sshll.u32 %s118_s0, 4  ;;  %vm40_vm2 = vcmask 67584   ;;  %s48_s18 = int_to_ptr.vmem [resolvable:$true] %s47_s18 }
   0xe   :  { %32 = vrot.lane.b32.xlu0 %v27_v0, %s117_s17 }
  0x78   :  { %v30_v1 = vpop.permute.xlu0 %29 }
  0x79   :  { %v36_v3 = vsel %vm35_vm0, %v27_v0, %v30_v1 }
  0x80   :  { %v33_v4 = vpop.permute.xlu0 %32 }
  0x81   :  { %v38_v5 = vsel %vm37_vm1, %v36_v3, %v33_v4 }
  0x82   :  { %v39_v6 = vadd.f32 %v38_v5, %v26_v2 }
  0x84   :  { %41 = vst.msk [vmem:[#allocation5] sm:$0x7] %vm40_vm2, %v39_v6 }
  0x85   :  { %52 = dma.vmem_to_hbm [thread:$0]  %s48_s18, 64, %s50_s21, [#allocation4]  }
  0x86   :  { %113 = dma.done.wait [#allocation4], 64  }
  0x87   :  { %114 = vsyncadd [#allocation4], 4294967232 }
  0x88   :  { %57 = vsyncpa [#allocation3], 1 }
  0x89   :  { %58 = vsyncpa [#allocation4], 1 }

</bundles_post_ra>
